<compile_context>
chip_gen: v7x
topology: tpu7x:2x2x1
jax: 0.10.0
libtpu: 0.0.40
codegen_flags: <defaults>
</compile_context>

<pallas_src>
import math

import jax
import jax.numpy as jnp
from jax import lax
from jax.experimental import pallas as pl
from jax.experimental.pallas import tpu as pltpu

_EPS = 1e-5
_PI = math.pi
_TWO_PI = 2.0 * math.pi
_SCALE = 2500.0 / 4096.0                 # (x+1)/2*5000/4096 == x*_SCALE + _SCALE
_ARG_SCALE = 0.5 / (1.0 + _EPS * 100.0)  # folds 1/(2*sqrt(.)) and /(1+eps*100)
_INV_TWO_PI = 1.0 / _TWO_PI
_ONE_THIRD = 1.0 / 3.0
_LANE = 128


def _acos(x):
    # TODO(synk): Mosaic has no arccos lowering; use the degree-3 Abramowitz-
    # Stegun 4.4.45 fit (|abs err| <= 6.7e-5, far inside the loss tolerance):
    # acos(|x|) = sqrt(1-|x|)*poly(|x|), acos(-x) = pi - acos(x).
    a = jnp.minimum(jnp.abs(x), 1.0)      # upper clamp guards rsqrt drift past 1
    p = jnp.float32(-0.0187293)
    for c in (0.0742610, -0.2121144, 1.5707288):
        p = p * a + jnp.float32(c)
    r = jnp.sqrt(1.0 - a) * p
    return jnp.where(x < 0.0, jnp.float32(_PI) - r, r)


def _rgb_to_hsi(rgb):
    """rgb: (3, C, 128) float32 in [-1, 1] -> (Hue, S, I), each (C, 128)."""
    t = jnp.clip(rgb * _SCALE + _SCALE, 0.0, 1.0)     # single fused scale+shift
    R, G, B = t[0], t[1], t[2]
    ssum = R + G + B
    I = ssum * _ONE_THIRD
    Min = jnp.minimum(jnp.minimum(R, G), B)
    # EUP approximate reciprocal frees VALU slots (a full divide is a Newton chain).
    S = 1.0 - 3.0 * Min * pl.reciprocal(ssum + _EPS, approx=True)
    rg = R - G
    rb = R - B
    gb = G - B
    q = rg * rg + rb * gb + _EPS          # == (rg - rb/2)^2 + 3/4*rb^2 + eps > 0
    # ((2R-G-B) / (2*sqrt(q))) / (1+100*eps) == (rg+rb) * rsqrt(q) * _ARG_SCALE
    # TODO(synk): if a bundle dump shows a VALU Newton step after vrsqrt, switch
    # to the approximate rsqrt path (loss tolerance covers it).
    arg = (rg + rb) * (lax.rsqrt(q) * _ARG_SCALE)
    theta = _acos(arg)
    H = jnp.where(B > G, jnp.float32(_TWO_PI) - theta, theta)
    Hue = jnp.where(S == 0.0, jnp.float32(0.0), H) * _INV_TWO_PI
    return Hue, S, I


def _make_kernel(tr, chunk, needs_mask):
    nchunks = tr // chunk

    def kernel(rows_ref, x_ref, y_ref, out_ref):
        # rows_ref: SMEM (1,) int32 — number of valid rows along the row axis.
        # x_ref/y_ref: (3, tr, 128) RGB tiles; out_ref: (chunk, 128) partial SSE.
        def chunk_d2(xs, ys, row0):
            hx = _rgb_to_hsi(xs)
            hy = _rgb_to_hsi(ys)
            d2 = None
            for ax, ay in zip(hx, hy):
                d = ay - ax
                d2 = d * d if d2 is None else d2 + d * d      # pure VPU
            if needs_mask:
                # Ragged last row-block: tail rows hold undefined (OOB) data, so
                # select-zero them (where, not multiply, to kill possible NaNs).
                row = row0 + lax.broadcasted_iota(jnp.int32, d2.shape, 0)
                d2 = jnp.where(row < rows_ref[0], d2, jnp.float32(0.0))
            return d2

        base = pl.program_id(1) * tr
        if nchunks == 1:
            out_ref[...] = chunk_d2(x_ref[...].astype(jnp.float32),
                                    y_ref[...].astype(jnp.float32), base)
        else:
            # fori_loop (not a Python for) bounds vreg live ranges to one chunk.
            def body(c, acc):
                r0 = pl.multiple_of(c * chunk, chunk)
                xs = x_ref[:, pl.ds(r0, chunk), :].astype(jnp.float32)
                ys = y_ref[:, pl.ds(r0, chunk), :].astype(jnp.float32)
                return acc + chunk_d2(xs, ys, base + r0)

            out_ref[...] = lax.fori_loop(
                0, nchunks, body, jnp.zeros((chunk, _LANE), jnp.float32))

    return kernel


def hsi_loss(inp, tgt, *, max_rows=512):
    """MSE(HSI(target), HSI(input)) for NCHW RGB tensors in [-1, 1]."""
    b, c, h, w = inp.shape
    assert c == 3 and tgt.shape == inp.shape
    hw = h * w
    rows0 = pl.cdiv(hw, _LANE)

    # NCHW -> (B, 3, rows0, 128): pure reshape, no HBM transpose.  jnp.pad (a
    # full read+write of both tensors) only triggers when hw % 128 != 0; padded
    # pixels get the same constant in input & target, so their HSI diff is 0.
    x = inp.reshape(b, 3, hw)
    y = tgt.reshape(b, 3, hw)
    lane_pad = rows0 * _LANE - hw
    if lane_pad:
        x = jnp.pad(x, ((0, 0), (0, 0), (0, lane_pad)))
        y = jnp.pad(y, ((0, 0), (0, 0), (0, lane_pad)))
    x = x.reshape(b, 3, rows0, _LANE)
    y = y.reshape(b, 3, rows0, _LANE)

    # Row tile: largest multiple-of-8 block <= max_rows (or the full row axis
    # for tiny images).  A ragged tail is masked inside the kernel, never padded.
    if rows0 < 8:
        tr = rows0
    else:
        tr = min(max_rows, (rows0 // 8) * 8)
    nrb = pl.cdiv(rows0, tr)
    # v7x has 2 TensorCores: make sure the ("parallel","parallel") grid has at
    # least 2 steps so both get work (matters once max_rows covers whole images).
    if b * nrb < 2 and rows0 >= 16:
        tr = ((pl.cdiv(rows0, 2) + 7) // 8) * 8
        nrb = pl.cdiv(rows0, tr)

    chunk = 16 if tr % 16 == 0 else (8 if tr % 8 == 0 else tr)
    needs_mask = (rows0 % tr) != 0

    kernel = _make_kernel(tr, chunk, needs_mask)
    rows_valid = jnp.full((1,), rows0, dtype=jnp.int32)

    cost = pl.CostEstimate(
        flops=int(120 * b * hw),
        transcendentals=int(8 * b * hw),
        bytes_accessed=int(2 * 3 * b * rows0 * _LANE * x.dtype.itemsize
                           + b * nrb * chunk * _LANE * 4),
    )

    partials = pl.pallas_call(
        kernel,
        out_shape=jax.ShapeDtypeStruct((b, nrb, chunk, _LANE), jnp.float32),
        grid_spec=pltpu.PrefetchScalarGridSpec(
            num_scalar_prefetch=1,
            grid=(b, nrb),
            in_specs=[
                # If DMA shows up exposed on v5e, add pipeline_mode=pl.Buffered(3).
                pl.BlockSpec((pl.Squeezed(), 3, tr, _LANE),
                             lambda bi, ri, nrows: (bi, 0, ri, 0)),
                pl.BlockSpec((pl.Squeezed(), 3, tr, _LANE),
                             lambda bi, ri, nrows: (bi, 0, ri, 0)),
            ],
            out_specs=pl.BlockSpec(
                (pl.Squeezed(), pl.Squeezed(), chunk, _LANE),
                lambda bi, ri, nrows: (bi, ri, 0, 0)),
        ),
        compiler_params=pltpu.CompilerParams(
            dimension_semantics=("parallel", "parallel")),
        cost_estimate=cost,
    )(rows_valid, x, y)

    # nn.MSELoss(): mean over all b*3*h*w HSI elements (padding/masking add 0).
    return jnp.sum(partials, dtype=jnp.float32) / jnp.float32(b * 3 * h * w)


def _hsi_loss_ref(inp, tgt):
    """Pure-JAX reference mirroring the PyTorch module (exact divides, jnp.arccos)."""
    def to_hsi(x):
        t = jnp.clip(((x + 1.0) / 2.0 * 5000.0) / 4096.0, 0.0, 1.0)  # NCHW
        R, G, B = t[:, 0], t[:, 1], t[:, 2]
        I = (R + G + B) / 3.0
        Min = jnp.minimum(jnp.minimum(R, G), B)
        S = 1.0 - 3.0 * Min / (R + G + B + _EPS)
        denom = 2.0 * jnp.sqrt((R - G) ** 2 + (R - B) * (G - B) + _EPS)
        theta = jnp.arccos(((R - G + R - B) / denom) / (1.0 + _EPS * 100.0))
        H = jnp.where(B > G, _TWO_PI - theta, theta)
        Hue = jnp.where(S == 0.0, 0.0, H) / _TWO_PI
        return jnp.stack([Hue, S, I], axis=1)
    return jnp.mean((to_hsi(tgt) - to_hsi(inp)) ** 2)


if __name__ == "__main__":
    key = jax.random.PRNGKey(0)
    k1, k2 = jax.random.split(key)
    inp = jax.random.uniform(k1, (2, 3, 16, 16), jnp.float32, minval=-1.0, maxval=1.0)
    tgt = jax.random.uniform(k2, (2, 3, 16, 16), jnp.float32, minval=-1.0, maxval=1.0)

    loss = jax.block_until_ready(hsi_loss(inp, tgt))
    ref = jax.block_until_ready(_hsi_loss_ref(inp, tgt))
    assert jnp.isfinite(loss)
    # Slack covers the EUP approximate reciprocal in S and the degree-3 acos
    # fit (|err| <= 6.7e-5); observed deltas are far smaller than this bound.
    assert abs(float(loss) - float(ref)) < 1e-3, (float(loss), float(ref))
    print("KERNEL_OK")
</pallas_src>

<mosaic_0001>
module attributes {stable_mosaic.version = 11 : i64} {
  func.func @kernel(%arg0: i32, %arg1: i32, %arg2: memref<1xi32, #tpu.memory_space<smem>>, %arg3: memref<1x3x2x128xf32, #tpu.memory_space<vmem>>, %arg4: memref<1x3x2x128xf32, #tpu.memory_space<vmem>>, %arg5: memref<1x1x2x128xf32, #tpu.memory_space<vmem>>) attributes {dimension_semantics = [#tpu.dimension_semantics<parallel>, #tpu.dimension_semantics<parallel>], iteration_bounds = array<i64: 2, 1>, scalar_prefetch = 1 : i64, scratch_operands = 0 : i64, tpu.core_type = #tpu.core_type<tc>, window_params = [{transform_indices = @transform_0, window_bounds = array<i64: 1, 3, 2, 128>}, {transform_indices = @transform_1, window_bounds = array<i64: 1, 3, 2, 128>}, {transform_indices = @transform_2, window_bounds = array<i64: 1, 1, 2, 128>}]} {
    %c0 = arith.constant 0 : index
    %c0_0 = arith.constant 0 : index
    %c0_1 = arith.constant 0 : index
    %c0_2 = arith.constant 0 : index
    %0 = vector.load %arg3[%c0, %c0_0, %c0_1, %c0_2] : memref<1x3x2x128xf32, #tpu.memory_space<vmem>>, vector<1x3x2x128xf32>
    %1 = vector.shape_cast %0 : vector<1x3x2x128xf32> to vector<3x2x128xf32>
    %c0_3 = arith.constant 0 : index
    %c0_4 = arith.constant 0 : index
    %c0_5 = arith.constant 0 : index
    %c0_6 = arith.constant 0 : index
    %2 = vector.load %arg4[%c0_3, %c0_4, %c0_5, %c0_6] : memref<1x3x2x128xf32, #tpu.memory_space<vmem>>, vector<1x3x2x128xf32>
    %3 = vector.shape_cast %2 : vector<1x3x2x128xf32> to vector<3x2x128xf32>
    %cst = arith.constant 0.610351563 : f32
    %4 = vector.broadcast %cst : f32 to vector<3x2x128xf32>
    %5 = arith.mulf %1, %4 : vector<3x2x128xf32>
    %cst_7 = arith.constant 0.610351563 : f32
    %6 = vector.broadcast %cst_7 : f32 to vector<3x2x128xf32>
    %7 = arith.addf %5, %6 : vector<3x2x128xf32>
    %cst_8 = arith.constant 0.000000e+00 : f32
    %cst_9 = arith.constant 1.000000e+00 : f32
    %8 = vector.broadcast %cst_8 : f32 to vector<3x2x128xf32>
    %9 = arith.maximumf %8, %7 : vector<3x2x128xf32>
    %10 = vector.broadcast %cst_9 : f32 to vector<3x2x128xf32>
    %11 = arith.minimumf %10, %9 : vector<3x2x128xf32>
    %12 = vector.extract_strided_slice %11 {offsets = [0, 0, 0], sizes = [1, 2, 128], strides = [1, 1, 1]} : vector<3x2x128xf32> to vector<1x2x128xf32>
    %13 = vector.shape_cast %12 : vector<1x2x128xf32> to vector<2x128xf32>
    %14 = vector.extract_strided_slice %11 {offsets = [1, 0, 0], sizes = [1, 2, 128], strides = [1, 1, 1]} : vector<3x2x128xf32> to vector<1x2x128xf32>
    %15 = vector.shape_cast %14 : vector<1x2x128xf32> to vector<2x128xf32>
    %16 = vector.extract_strided_slice %11 {offsets = [2, 0, 0], sizes = [1, 2, 128], strides = [1, 1, 1]} : vector<3x2x128xf32> to vector<1x2x128xf32>
    %17 = vector.shape_cast %16 : vector<1x2x128xf32> to vector<2x128xf32>
    %18 = arith.addf %13, %15 : vector<2x128xf32>
    %19 = arith.addf %18, %17 : vector<2x128xf32>
    %cst_10 = arith.constant 0.333333343 : f32
    %20 = vector.broadcast %cst_10 : f32 to vector<2x128xf32>
    %21 = arith.mulf %19, %20 : vector<2x128xf32>
    %22 = arith.minimumf %13, %15 : vector<2x128xf32>
    %23 = arith.minimumf %22, %17 : vector<2x128xf32>
    %cst_11 = arith.constant 3.000000e+00 : f32
    %24 = vector.broadcast %cst_11 : f32 to vector<2x128xf32>
    %25 = arith.mulf %24, %23 : vector<2x128xf32>
    %cst_12 = arith.constant 9.99999974E-6 : f32
    %26 = vector.broadcast %cst_12 : f32 to vector<2x128xf32>
    %27 = arith.addf %19, %26 : vector<2x128xf32>
    %28 = tpu.reciprocal %27 {approx = true} : vector<2x128xf32> -> vector<2x128xf32>
    %29 = arith.mulf %25, %28 : vector<2x128xf32>
    %cst_13 = arith.constant 1.000000e+00 : f32
    %30 = vector.broadcast %cst_13 : f32 to vector<2x128xf32>
    %31 = arith.subf %30, %29 : vector<2x128xf32>
    %32 = arith.subf %13, %15 : vector<2x128xf32>
    %33 = arith.subf %13, %17 : vector<2x128xf32>
    %34 = arith.subf %15, %17 : vector<2x128xf32>
    %35 = arith.mulf %32, %32 : vector<2x128xf32>
    %36 = arith.mulf %33, %34 : vector<2x128xf32>
    %37 = arith.addf %35, %36 : vector<2x128xf32>
    %cst_14 = arith.constant 9.99999974E-6 : f32
    %38 = vector.broadcast %cst_14 : f32 to vector<2x128xf32>
    %39 = arith.addf %37, %38 : vector<2x128xf32>
    %40 = arith.addf %32, %33 : vector<2x128xf32>
    %41 = math.rsqrt %39 : vector<2x128xf32>
    %cst_15 = arith.constant 0.499500513 : f32
    %42 = vector.broadcast %cst_15 : f32 to vector<2x128xf32>
    %43 = arith.mulf %41, %42 : vector<2x128xf32>
    %44 = arith.mulf %40, %43 : vector<2x128xf32>
    %45 = math.absf %44 : vector<2x128xf32>
    %cst_16 = arith.constant 1.000000e+00 : f32
    %46 = vector.broadcast %cst_16 : f32 to vector<2x128xf32>
    %47 = arith.minimumf %45, %46 : vector<2x128xf32>
    %cst_17 = arith.constant -1.872930e-02 : f32
    %48 = vector.broadcast %cst_17 : f32 to vector<2x128xf32>
    %49 = arith.mulf %48, %47 : vector<2x128xf32>
    %cst_18 = arith.constant 7.426100e-02 : f32
    %50 = vector.broadcast %cst_18 : f32 to vector<2x128xf32>
    %51 = arith.addf %49, %50 : vector<2x128xf32>
    %52 = arith.mulf %51, %47 : vector<2x128xf32>
    %cst_19 = arith.constant -0.212114394 : f32
    %53 = vector.broadcast %cst_19 : f32 to vector<2x128xf32>
    %54 = arith.addf %52, %53 : vector<2x128xf32>
    %55 = arith.mulf %54, %47 : vector<2x128xf32>
    %cst_20 = arith.constant 1.57072878 : f32
    %56 = vector.broadcast %cst_20 : f32 to vector<2x128xf32>
    %57 = arith.addf %55, %56 : vector<2x128xf32>
    %cst_21 = arith.constant 1.000000e+00 : f32
    %58 = vector.broadcast %cst_21 : f32 to vector<2x128xf32>
    %59 = arith.subf %58, %47 : vector<2x128xf32>
    %60 = math.sqrt %59 : vector<2x128xf32>
    %61 = arith.mulf %60, %57 : vector<2x128xf32>
    %cst_22 = arith.constant 0.000000e+00 : f32
    %62 = vector.broadcast %cst_22 : f32 to vector<2x128xf32>
    %63 = arith.cmpf olt, %44, %62 : vector<2x128xf32>
    %cst_23 = arith.constant 3.14159274 : f32
    %64 = vector.broadcast %cst_23 : f32 to vector<2x128xf32>
    %65 = arith.subf %64, %61 : vector<2x128xf32>
    %66 = arith.select %63, %65, %61 : vector<2x128xi1>, vector<2x128xf32>
    %67 = arith.cmpf ogt, %17, %15 : vector<2x128xf32>
    %cst_24 = arith.constant 6.28318548 : f32
    %68 = vector.broadcast %cst_24 : f32 to vector<2x128xf32>
    %69 = arith.subf %68, %66 : vector<2x128xf32>
    %70 = arith.select %67, %69, %66 : vector<2x128xi1>, vector<2x128xf32>
    %cst_25 = arith.constant 0.000000e+00 : f32
    %71 = vector.broadcast %cst_25 : f32 to vector<2x128xf32>
    %72 = arith.cmpf oeq, %31, %71 : vector<2x128xf32>
    %cst_26 = arith.constant 0.000000e+00 : f32
    %73 = vector.broadcast %cst_26 : f32 to vector<2x128xf32>
    %74 = arith.select %72, %73, %70 : vector<2x128xi1>, vector<2x128xf32>
    %cst_27 = arith.constant 0.159154937 : f32
    %75 = vector.broadcast %cst_27 : f32 to vector<2x128xf32>
    %76 = arith.mulf %74, %75 : vector<2x128xf32>
    %cst_28 = arith.constant 0.610351563 : f32
    %77 = vector.broadcast %cst_28 : f32 to vector<3x2x128xf32>
    %78 = arith.mulf %3, %77 : vector<3x2x128xf32>
    %cst_29 = arith.constant 0.610351563 : f32
    %79 = vector.broadcast %cst_29 : f32 to vector<3x2x128xf32>
    %80 = arith.addf %78, %79 : vector<3x2x128xf32>
    %cst_30 = arith.constant 0.000000e+00 : f32
    %cst_31 = arith.constant 1.000000e+00 : f32
    %81 = vector.broadcast %cst_30 : f32 to vector<3x2x128xf32>
    %82 = arith.maximumf %81, %80 : vector<3x2x128xf32>
    %83 = vector.broadcast %cst_31 : f32 to vector<3x2x128xf32>
    %84 = arith.minimumf %83, %82 : vector<3x2x128xf32>
    %85 = vector.extract_strided_slice %84 {offsets = [0, 0, 0], sizes = [1, 2, 128], strides = [1, 1, 1]} : vector<3x2x128xf32> to vector<1x2x128xf32>
    %86 = vector.shape_cast %85 : vector<1x2x128xf32> to vector<2x128xf32>
    %87 = vector.extract_strided_slice %84 {offsets = [1, 0, 0], sizes = [1, 2, 128], strides = [1, 1, 1]} : vector<3x2x128xf32> to vector<1x2x128xf32>
    %88 = vector.shape_cast %87 : vector<1x2x128xf32> to vector<2x128xf32>
    %89 = vector.extract_strided_slice %84 {offsets = [2, 0, 0], sizes = [1, 2, 128], strides = [1, 1, 1]} : vector<3x2x128xf32> to vector<1x2x128xf32>
    %90 = vector.shape_cast %89 : vector<1x2x128xf32> to vector<2x128xf32>
    %91 = arith.addf %86, %88 : vector<2x128xf32>
    %92 = arith.addf %91, %90 : vector<2x128xf32>
    %cst_32 = arith.constant 0.333333343 : f32
    %93 = vector.broadcast %cst_32 : f32 to vector<2x128xf32>
    %94 = arith.mulf %92, %93 : vector<2x128xf32>
    %95 = arith.minimumf %86, %88 : vector<2x128xf32>
    %96 = arith.minimumf %95, %90 : vector<2x128xf32>
    %cst_33 = arith.constant 3.000000e+00 : f32
    %97 = vector.broadcast %cst_33 : f32 to vector<2x128xf32>
    %98 = arith.mulf %97, %96 : vector<2x128xf32>
    %cst_34 = arith.constant 9.99999974E-6 : f32
    %99 = vector.broadcast %cst_34 : f32 to vector<2x128xf32>
    %100 = arith.addf %92, %99 : vector<2x128xf32>
    %101 = tpu.reciprocal %100 {approx = true} : vector<2x128xf32> -> vector<2x128xf32>
    %102 = arith.mulf %98, %101 : vector<2x128xf32>
    %cst_35 = arith.constant 1.000000e+00 : f32
    %103 = vector.broadcast %cst_35 : f32 to vector<2x128xf32>
    %104 = arith.subf %103, %102 : vector<2x128xf32>
    %105 = arith.subf %86, %88 : vector<2x128xf32>
    %106 = arith.subf %86, %90 : vector<2x128xf32>
    %107 = arith.subf %88, %90 : vector<2x128xf32>
    %108 = arith.mulf %105, %105 : vector<2x128xf32>
    %109 = arith.mulf %106, %107 : vector<2x128xf32>
    %110 = arith.addf %108, %109 : vector<2x128xf32>
    %cst_36 = arith.constant 9.99999974E-6 : f32
    %111 = vector.broadcast %cst_36 : f32 to vector<2x128xf32>
    %112 = arith.addf %110, %111 : vector<2x128xf32>
    %113 = arith.addf %105, %106 : vector<2x128xf32>
    %114 = math.rsqrt %112 : vector<2x128xf32>
    %cst_37 = arith.constant 0.499500513 : f32
    %115 = vector.broadcast %cst_37 : f32 to vector<2x128xf32>
    %116 = arith.mulf %114, %115 : vector<2x128xf32>
    %117 = arith.mulf %113, %116 : vector<2x128xf32>
    %118 = math.absf %117 : vector<2x128xf32>
    %cst_38 = arith.constant 1.000000e+00 : f32
    %119 = vector.broadcast %cst_38 : f32 to vector<2x128xf32>
    %120 = arith.minimumf %118, %119 : vector<2x128xf32>
    %cst_39 = arith.constant -1.872930e-02 : f32
    %121 = vector.broadcast %cst_39 : f32 to vector<2x128xf32>
    %122 = arith.mulf %121, %120 : vector<2x128xf32>
    %cst_40 = arith.constant 7.426100e-02 : f32
    %123 = vector.broadcast %cst_40 : f32 to vector<2x128xf32>
    %124 = arith.addf %122, %123 : vector<2x128xf32>
    %125 = arith.mulf %124, %120 : vector<2x128xf32>
    %cst_41 = arith.constant -0.212114394 : f32
    %126 = vector.broadcast %cst_41 : f32 to vector<2x128xf32>
    %127 = arith.addf %125, %126 : vector<2x128xf32>
    %128 = arith.mulf %127, %120 : vector<2x128xf32>
    %cst_42 = arith.constant 1.57072878 : f32
    %129 = vector.broadcast %cst_42 : f32 to vector<2x128xf32>
    %130 = arith.addf %128, %129 : vector<2x128xf32>
    %cst_43 = arith.constant 1.000000e+00 : f32
    %131 = vector.broadcast %cst_43 : f32 to vector<2x128xf32>
    %132 = arith.subf %131, %120 : vector<2x128xf32>
    %133 = math.sqrt %132 : vector<2x128xf32>
    %134 = arith.mulf %133, %130 : vector<2x128xf32>
    %cst_44 = arith.constant 0.000000e+00 : f32
    %135 = vector.broadcast %cst_44 : f32 to vector<2x128xf32>
    %136 = arith.cmpf olt, %117, %135 : vector<2x128xf32>
    %cst_45 = arith.constant 3.14159274 : f32
    %137 = vector.broadcast %cst_45 : f32 to vector<2x128xf32>
    %138 = arith.subf %137, %134 : vector<2x128xf32>
    %139 = arith.select %136, %138, %134 : vector<2x128xi1>, vector<2x128xf32>
    %140 = arith.cmpf ogt, %90, %88 : vector<2x128xf32>
    %cst_46 = arith.constant 6.28318548 : f32
    %141 = vector.broadcast %cst_46 : f32 to vector<2x128xf32>
    %142 = arith.subf %141, %139 : vector<2x128xf32>
    %143 = arith.select %140, %142, %139 : vector<2x128xi1>, vector<2x128xf32>
    %cst_47 = arith.constant 0.000000e+00 : f32
    %144 = vector.broadcast %cst_47 : f32 to vector<2x128xf32>
    %145 = arith.cmpf oeq, %104, %144 : vector<2x128xf32>
    %cst_48 = arith.constant 0.000000e+00 : f32
    %146 = vector.broadcast %cst_48 : f32 to vector<2x128xf32>
    %147 = arith.select %145, %146, %143 : vector<2x128xi1>, vector<2x128xf32>
    %cst_49 = arith.constant 0.159154937 : f32
    %148 = vector.broadcast %cst_49 : f32 to vector<2x128xf32>
    %149 = arith.mulf %147, %148 : vector<2x128xf32>
    %150 = arith.subf %149, %76 : vector<2x128xf32>
    %151 = arith.mulf %150, %150 : vector<2x128xf32>
    %152 = arith.subf %104, %31 : vector<2x128xf32>
    %153 = arith.mulf %152, %152 : vector<2x128xf32>
    %154 = arith.addf %151, %153 : vector<2x128xf32>
    %155 = arith.subf %94, %21 : vector<2x128xf32>
    %156 = arith.mulf %155, %155 : vector<2x128xf32>
    %157 = arith.addf %154, %156 : vector<2x128xf32>
    %c0_50 = arith.constant 0 : index
    %c0_51 = arith.constant 0 : index
    %c0_52 = arith.constant 0 : index
    %c0_53 = arith.constant 0 : index
    %158 = vector.load %arg5[%c0_50, %c0_51, %c0_52, %c0_53] : memref<1x1x2x128xf32, #tpu.memory_space<vmem>>, vector<1x1x2x128xf32>
    %159 = vector.shape_cast %158 : vector<1x1x2x128xf32> to vector<2x128xf32>
    %160 = vector.shape_cast %157 : vector<2x128xf32> to vector<1x1x2x128xf32>
    tpu.vector_store %arg5[%c0_50, %c0_51, %c0_52, %c0_53], %160 {strides = array<i32>} : memref<1x1x2x128xf32, #tpu.memory_space<vmem>>, vector<1x1x2x128xf32>,
    return
  }
  func.func @transform_0(%arg0: i32, %arg1: i32, %arg2: memref<1xi32, #tpu.memory_space<smem>>) -> (i32, i32, i32, i32) {
    %c0_i32 = arith.constant 0 : i32
    %c0_i32_0 = arith.constant 0 : i32
    %c0_i32_1 = arith.constant 0 : i32
    return %arg0, %c0_i32, %arg1, %c0_i32_0 : i32, i32, i32, i32
  }
  func.func @transform_1(%arg0: i32, %arg1: i32, %arg2: memref<1xi32, #tpu.memory_space<smem>>) -> (i32, i32, i32, i32) {
    %c0_i32 = arith.constant 0 : i32
    %c0_i32_0 = arith.constant 0 : i32
    %c0_i32_1 = arith.constant 0 : i32
    return %arg0, %c0_i32, %arg1, %c0_i32_0 : i32, i32, i32, i32
  }
  func.func @transform_2(%arg0: i32, %arg1: i32, %arg2: memref<1xi32, #tpu.memory_space<smem>>) -> (i32, i32, i32, i32) {
    %c0_i32 = arith.constant 0 : i32
    %c0_i32_0 = arith.constant 0 : i32
    %c0_i32_1 = arith.constant 0 : i32
    return %arg0, %arg1, %c0_i32, %c0_i32_0 : i32, i32, i32, i32
  }
}

</mosaic_0001>

<bundles_post_ra>
// kernel: tpu_custom_call.1
= control target key start
LH: loop header
LB: loop body
LE: loop exit
PB: predicated region body
PF: predicated region fallthrough
CT: control target
= control target key end

     0   :  { %9 = vsyncpa [#allocation5], 0  ;;  %s1024_s0 = inlined_call_operand.<no memory space> [shape: s32[1], index: 0, kind: input, shape index: {}]   ;;  %s1025_s1 = inlined_call_operand.hbm [shape: f32[2,3,2,128], index: 1, kind: input, shape index: {}]   ;;  %s1026_s2 = inlined_call_operand.hbm [shape: f32[2,3,2,128], index: 2, kind: input, shape index: {}]   ;;  %s1027_s3 = inlined_call_operand.hbm [shape: f32[2,1,2,128], index: 3, kind: output, shape index: {}]  }
   0x1   :  { %11 = vsyncpa [#allocation5 + $0x1], 0 }
   0x2   :  { %12 = vsyncpa [#allocation8], 0 }
   0x3   :  { %14 = vsyncpa [#allocation8 + $0x1], 0 }
   0x4   :  { %15 = vsyncpa [#allocation6], 0 }
   0x5   :  { %17 = vsyncpa [#allocation6 + $0x1], 0  ;;  %s749_s12 = smov 0   ;;  %s751_s13 = smov 0  }
   0x6   :  { %s753_s0 = smov 0   ;;  %s755_s14 = smov 0  }
   0x7   :  { %s757_s15 = smov 0   ;;  %s759_s16 = smov 0  }
   0x8 LB: > { %s478_s17 = sadd.s32 4294967295, %s722_s16   ;;  %s479_s18 = sadd.s32 4294967294, %s722_s16   ;;  %s722_s16 = sphi %s759_s16, %s23_s16   ;;  %s718_s15 = sphi %s757_s15, %s1045_s15   ;;  %s714_s14 = sphi %s755_s14, %s1044_s14   ;;  %s710_s0 = sphi %s753_s0, %s1043_s0   ;;  %s706_s13 = sphi %s751_s13, %s1042_s13   ;;  %s702_s12 = sphi %s749_s12, %s1041_s12  }
   0x9   : > { %s35_s19 = sadd.s32 1, %s718_s15  ;;  %s44_s20 = sadd.s32 1, %s710_s0 }
   0xa   : > { %p37_p0 = scmp.ge.s32.totalorder %s35_s19, 2  ;;  %p51_p1 = scmp.ne.s32.totalorder %s710_s0, %s706_s13 }
   0xb   : > { %p52_p2 = scmp.eq.s32.totalorder %s722_s16, 0  ;;  %p57_p3 = scmp.ne.s32.totalorder %s706_s13, %s702_s12 }
   0xc   : > { %s1047_s19 = smov (%p37_p0, %s35_s19), 0  ;;  %p58_p5 = scmp.eq.s32.totalorder %s478_s17, 0 }
   0xd   : > { %p790_p4 = por %p52_p2, %p51_p1  ;;  %s39_s22 = ssub.s32 %s718_s15, %s1047_s19 }
   0xe   : > { %p111_p6 = scmp.eq.s32.totalorder %s478_s17, 1  ;;  %p42_p7 = scmp.eq.s32.totalorder %s39_s22, 0 }
   0xf   : > { %p796_p8 = por %p58_p5, %p57_p3  ;;  %p117_p10 = scmp.eq.s32.totalorder %s479_s18, 1 }
  0x10   : > { %p800_p9 = por %p111_p6, %p51_p1  ;;  %p512_p13 = scmp.lt.s32.totalorder %s722_s16, 2 }
  0x11   : > { %s1031_s23 = scalar_select %p796_p8, 1, 0 }
  0x12   : > { %s1032_s24 = scalar_select %p800_p9, 1, 0 }
  0x13   : > { %s805_s25 = scalar_select %p42_p7, %s710_s0, %s44_s20  }
  0x14   : > { %p807_p11 = por %p117_p10, %p57_p3  ;;  %s814_s27 = sand.u32 1, %s710_s0  }
  0x15   : > { %s490_s28 = smul.u32 6, %s814_s27  ;;  %p820_p0 = pnand %p512_p13, %p790_p4 }
  0x16   : > { %s1033_s26 = scalar_select %p807_p11, 1, 0 }
  0x17   : > { %s491_s29 = smul.u32 96, %s718_s15  ;;  %s141_s7 = scalar_lea.vmem [#allocation4], %s490_s28 }
  0x18   : > { %s149_s8 = sshll.u32 %s141_s7, 4  ;;  %s138_s9 = scalar_lea.sflag [#allocation5], %s814_s27  ;;  %s833_s8 = int_to_ptr.vmem [resolvable:$true] %s149_s8 }
  0x19   : > { %s829_s6 = scalar_lea.hbm %s1025_s1, %s491_s29  ;;  %p578_p3 = pneg %p820_p0 }
  0x1a   : > { %s576_s10 = scalar_lea.hbm %s829_s6, 96  ;;  %s581_s18 = scalar_lea.hbm %s1025_s1, 192 }
  0x1b   : > { %p577_p2 = scmp.ne.s32.totalorder %s829_s6, %s576_s10  ;;  %p582_p6 = scmp.lt.u32.totalorder %s829_s6, %s1025_s1 }
  0x1c   : > { %p583_p7 = scmp.lt.u32.totalorder %s581_s18, %s576_s10  ;;  %p585_p13 = scmp.lt.u32.totalorder %s576_s10, %s829_s6 }
  0x1d   : > { %p579_p4 = pnand %p578_p3, %p577_p2 }
  0x1e   : > { %p584_p10 = por %p583_p7, %p582_p6 }
  0x1f   : > { %p580_p5 = pneg %p579_p4 }
  0x20   : > { %p586_p12 = por %p585_p13, %p584_p10 }
  0x22   : > { %p587_p1 = pnand %p586_p12, %p580_p5 }
  0x24   : > { %590 = shalt.err (!%p587_p1)
}
  0x25   : > { %s591_s22 = scalar_lea.vmem %s833_s8, 96  ;;  %s724_s4 = smov [#allocation4]  }
  0x26   : > { %p592_p2 = scmp.ne.s32.totalorder %s833_s8, %s591_s22  ;;  %s596_s5 = sshll.u32 %s724_s4, 4  ;;  %s597_s5 = int_to_ptr.vmem [resolvable:$false] %s596_s5 }
  0x27   : > { %s598_s7 = scalar_lea.vmem %s597_s5, 192  ;;  %p599_p9 = scmp.lt.s32.totalorder %s833_s8, %s597_s5 }
  0x28   : > { %p594_p4 = pnand %p592_p2, %p578_p3  ;;  %p600_p6 = scmp.lt.s32.totalorder %s598_s7, %s591_s22 }
  0x2a   : > { %p595_p11 = pneg %p594_p4  ;;  %p601_p7 = por %p600_p6, %p599_p9 }
  0x2c   : > { %p602_p10 = pnand %p601_p7, %p595_p11 }
  0x2e   : > { %605 = shalt.err (!%p602_p10)
}
  0x2f   : > { %s725_s10 = smov 32   ;;  %s726_s11 = smov 2  }
  0x30   : > { %504 = dma.hbm_to_vmem [thread:$0]  (!%p820_p0), %s829_s6, 96, %s833_s8, %s138_s9, %s725_s10, %s725_s10, %s726_s11  }
  0x31   : > { %p179_p9 = scmp.lt.s32.totalorder %s722_s16, 3  ;;  %s873_s20 = scalar_lea.hbm %s1026_s2, %s491_s29 }
  0x32   : > { %p1035_p11 = scmp.ge.s32.totalorder %s722_s16, 1  ;;  %s163_s22 = scalar_lea.vmem [#allocation7], %s490_s28 }
  0x33   : > { %s171_s4 = sshll.u32 %s163_s22, 4  ;;  %s160_s6 = scalar_lea.sflag [#allocation8], %s814_s27  ;;  %s883_s4 = int_to_ptr.vmem [resolvable:$true] %s171_s4 }
  0x34   : > { %p877_p12 = pnand %p1035_p11, %p179_p9  ;;  %s606_s8 = scalar_lea.hbm %s873_s20, 96 }
  0x35   : > { %p607_p1 = scmp.ne.s32.totalorder %s873_s20, %s606_s8  ;;  %s611_s5 = scalar_lea.hbm %s1026_s2, 192 }
  0x36   : > { %p612_p2 = scmp.lt.u32.totalorder %s873_s20, %s1026_s2  ;;  %p613_p4 = scmp.lt.u32.totalorder %s611_s5, %s606_s8 }
  0x37   : > { %p609_p5 = pnand %p607_p1, %p578_p3  ;;  %p615_p7 = scmp.lt.u32.totalorder %s606_s8, %s873_s20 }
  0x38   : > { %p614_p6 = por %p613_p4, %p612_p2 }
  0x39   : > { %p610_p13 = pneg %p609_p5 }
  0x3a   : > { %p616_p10 = por %p615_p7, %p614_p6 }
  0x3c   : > { %p617_p9 = pnand %p616_p10, %p610_p13 }
  0x3e   : > { %620 = shalt.err (!%p617_p9)
}
  0x3f   : > { %s621_s28 = scalar_lea.vmem %s883_s4, 96  ;;  %s727_s18 = smov [#allocation7]  }
  0x40   : > { %p622_p11 = scmp.ne.s32.totalorder %s883_s4, %s621_s28  ;;  %s626_s22 = sshll.u32 %s727_s18, 4  ;;  %s627_s22 = int_to_ptr.vmem [resolvable:$false] %s626_s22 }
  0x41   : > { %s628_s29 = scalar_lea.vmem %s627_s22, 192  ;;  %p629_p8 = scmp.lt.s32.totalorder %s883_s4, %s627_s22 }
  0x42   : > { %p624_p1 = pnand %p622_p11, %p578_p3  ;;  %p630_p2 = scmp.lt.s32.totalorder %s628_s29, %s621_s28 }
  0x44   : > { %p625_p5 = pneg %p624_p1  ;;  %p631_p4 = por %p630_p2, %p629_p8 }
  0x46   : > { %p632_p6 = pnand %p631_p4, %p625_p5 }
  0x48   : > { %635 = shalt.err (!%p632_p6)
}
  0x49   : > { %507 = dma.hbm_to_vmem [thread:$0]  (!%p820_p0), %s873_s20, 96, %s883_s4, %s160_s6, %s725_s10, %s725_s10, %s726_s11  }
  0x4a   : > { %183 = sbr.rel (%p877_p12) target bundleno = 173 (0xad), region = 28  ;;  %s917_s8 = sand.u32 (!%p877_p12), 1, %s706_s13  }
  0x4b   : > { %s494_s9 = smul.u32 (!%p877_p12), 6, %s917_s8  ;;  %s186_s5 = scalar_lea.sflag (!%p877_p12), [#allocation5], %s917_s8 }
  0x4c   : > { %p1037_p8 = scmp.ne.s32.totalorder (!%p877_p12), %s1031_s23, 0 }
  0x4d   : > { %s189_s30 = scalar_lea.vmem (!%p877_p12), [#allocation4], %s494_s9 }
  0x51   : > { %689 = dma.done.wait (%p1037_p8), %s186_s5, 96  }
  0x52   : > { %691 = vsyncadd (%p1037_p8), %s186_s5, 4294967200  ;;  %s195_s27 = scalar_lea.sflag [#allocation8], %s917_s8  ;;  %s198_s10 = scalar_lea.vmem [#allocation7], %s494_s9 }
  0x53   : > { %693 = dma.done.wait (%p1037_p8), %s195_s27, 96  }
  0x54   : > { %695 = vsyncadd (%p1037_p8), %s195_s27, 4294967200  ;;  %v224_v0 = vld [vmem:[%s189_s30] sm:$0x3]  ;;  %v225_v1 = vld [vmem:[%s189_s30 + $0x2] sm:$0x3]  ;;  %s485_s23 = sshll.u32 %s917_s8, 1 }
  0x55   : > { %v226_v2 = vld [vmem:[%s189_s30 + $0x4] sm:$0x3]  ;;  %v227_v3 = vld [vmem:[%s198_s10] sm:$0x3]  ;;  %v228_v4 = vld [vmem:[%s198_s10 + $0x2] sm:$0x3] }
  0x56   : > { %v229_v5 = vld [vmem:[%s198_s10 + $0x4] sm:$0x3]  ;;  %v230_v6 = vmul.f32 0.61035156, %v224_v0  ;;  %v231_v7 = vmul.f32 0.61035156, %v225_v1  ;;  %v232_v8 = vmul.f32 0.61035156, %v226_v2  ;;  %v289_v9 = vmul.f32 0.61035156, %v227_v3 }
  0x57   : > { %v290_v10 = vmul.f32 0.61035156, %v228_v4  ;;  %v291_v11 = vmul.f32 0.61035156, %v229_v5  ;;  %s223_s11 = scalar_lea.vmem [#allocation9], %s485_s23  ;;  %s487_s21 = sshll.u32 %s714_s14, 5 }
  0x58   : > { %v233_v12 = vadd.f32 0.61035156, %v230_v6  ;;  %v234_v13 = vadd.f32 0.61035156, %v231_v7  ;;  %v235_v14 = vadd.f32 0.61035156, %v232_v8  ;;  %v292_v15 = vadd.f32 0.61035156, %v289_v9  ;;  %s372_s20 = sshll.u32 %s223_s11, 4  ;;  %s977_s7 = scalar_lea.hbm %s1027_s3, %s487_s21  ;;  %s972_s20 = int_to_ptr.vmem [resolvable:$true] %s372_s20 }
  0x59   : > { %v293_v16 = vadd.f32 0.61035156, %v290_v10  ;;  %v294_v17 = vadd.f32 0.61035156, %v291_v11  ;;  %s358_s17 = scalar_lea.sflag [#allocation6], %s917_s8  ;;  %s636_s28 = scalar_lea.vmem %s972_s20, 32 }
  0x5a   : > { %v236_v18 = vmax.f32 %v233_v12, 0.0  ;;  %v237_v19 = vmax.f32 %v234_v13, 0.0  ;;  %v238_v20 = vmax.f32 %v235_v14, 0.0  ;;  %v295_v21 = vmax.f32 %v292_v15, 0.0  ;;  %p637_p0 = scmp.ne.s32.totalorder %s972_s20, %s636_s28  ;;  %p1038_p3 = scmp.ne.s32.totalorder %s1032_s24, 0 }
  0x5b   : > { %v296_v22 = vmax.f32 %v293_v16, 0.0  ;;  %v297_v23 = vmax.f32 %v294_v17, 0.0  ;;  %s728_s14 = smov [#allocation9]  }
  0x5c   : > { %v239_v24 = vmin.f32 %v236_v18, 1.0  ;;  %v930_v25 = vmin.f32 %v237_v19, 1.0  ;;  %v932_v26 = vmin.f32 %v238_v20, 1.0  ;;  %v298_v27 = vmin.f32 %v295_v21, 1.0  ;;  %p638_p12 = pnand %p637_p0, %p1038_p3  ;;  %s640_s18 = sshll.u32 %s728_s14, 4  ;;  %s641_s18 = int_to_ptr.vmem [resolvable:$false] %s640_s18 }
  0x5d   : > { %v934_v28 = vmin.f32 %v296_v22, 1.0  ;;  %v938_v31 = vmin.f32 %v297_v23, 1.0  ;;  %s642_s22 = scalar_lea.vmem %s641_s18, 64  ;;  %p643_p7 = scmp.lt.s32.totalorder %s972_s20, %s641_s18 }
  0x5e   : > { %v252_v29 = vsub.f32 %v239_v24, %v930_v25  ;;  %v253_v30 = vsub.f32 %v239_v24, %v932_v26  ;;  %v254_v32 = vsub.f32 %v930_v25, %v932_v26  ;;  %v242_v44 = vadd.f32 %v930_v25, %v239_v24  ;;  %p639_p13 = pneg %p638_p12  ;;  %p644_p10 = scmp.lt.s32.totalorder %s642_s22, %s636_s28 }
  0x5f   : > { %v311_v35 = vsub.f32 %v298_v27, %v934_v28  ;;  %v312_v36 = vsub.f32 %v298_v27, %v938_v31  ;;  %v313_v38 = vsub.f32 %v934_v28, %v938_v31  ;;  %v301_v50 = vadd.f32 %v934_v28, %v298_v27 }
  0x60   : > { %v255_v33 = vmul.f32 %v252_v29, %v252_v29  ;;  %v256_v34 = vmul.f32 %v254_v32, %v253_v30  ;;  %v259_v45 = vadd.f32 %v253_v30, %v252_v29  ;;  %v948_v48 = vadd.f32 %v242_v44, %v932_v26  ;;  %p645_p9 = por %p644_p10, %p643_p7 }
  0x61   : > { %v314_v39 = vmul.f32 %v311_v35, %v311_v35  ;;  %v315_v41 = vmul.f32 %v313_v38, %v312_v36  ;;  %v318_v51 = vadd.f32 %v312_v36, %v311_v35  ;;  %v953_v57 = vadd.f32 %v301_v50, %v938_v31 }
  0x62   : > { %v257_v37 = vadd.f32 %v256_v34, %v255_v33  ;;  %v248_v54 = vadd.f32 1e-05, %v948_v48  ;;  %v245_v0 = vmin.f32 %v239_v24, %v930_v25  ;;  %v304_v7 = vmin.f32 %v298_v27, %v934_v28  ;;  %p646_p11 = pnand %p645_p9, %p639_p13 }
  0x63   : > { %v316_v42 = vadd.f32 %v315_v41, %v314_v39  ;;  %v307_v63 = vadd.f32 1e-05, %v953_v57  ;;  %vm283_vm5 = vcmp.gt.f32.partialorder %v932_v26, %v930_v25  ;;  %vm342_vm8 = vcmp.gt.f32.partialorder %v938_v31, %v934_v28 }
  0x64   : > { %v258_v40 = vadd.f32 1e-05, %v257_v37  ;;  %v246_v6 = vmin.f32 %v245_v0, %v932_v26  ;;  %v305_v13 = vmin.f32 %v304_v7, %v938_v31 }
  0x65   : > { %v317_v43 = vadd.f32 1e-05, %v316_v42 }
  0x66   : > { %564 = vrsqrt.f32 %v258_v40  ;;  %v247_v12 = vmul.f32 3.0, %v246_v6  ;;  %v306_v22 = vmul.f32 3.0, %v305_v13 }
  0x67   : > { %566 = vrsqrt.f32 %v317_v43 }
  0x68   : > { %568 = vrcp.f32 %v248_v54 }
  0x70   : > { %v565_v46 = vpop.eup %564 }
  0x71   : > { %v261_v47 = vmul.f32 0.4995005, %v565_v46  ;;  %v567_v52 = vpop.eup %566 }
  0x72   : > { %v320_v55 = vmul.f32 0.4995005, %v567_v52  ;;  %v569_v11 = vpop.eup %568 }
  0x73   : > { %v262_v49 = vmul.f32 %v261_v47, %v259_v45  ;;  %v250_v20 = vmul.f32 %v569_v11, %v247_v12  ;;  %v244_v45 = vmul.f32 0.33333334, %v948_v48 }
  0x74   : > { %v955_v58 = vmul.f32 %v320_v55, %v318_v51 }
  0x75   : > { %v263_v53 = vand.u32 2147483647, %v262_v49  ;;  %vm280_vm3 = vcmp.lt.f32.partialorder %v262_v49, 0.0  ;;  %v251_v34 = vsub.f32 1.0, %v250_v20  ;;  %v303_v49 = vmul.f32 0.33333334, %v953_v57 }
  0x76   : > { %v322_v61 = vand.u32 2147483647, %v955_v58  ;;  %vm339_vm7 = vcmp.lt.f32.partialorder %v955_v58, 0.0 }
  0x77   : > { %v264_v56 = vmin.f32 %v263_v53, 1.0  ;;  %vm286_vm6 = vcmp.eq.f32.partialorder %v251_v34, 0.0  ;;  %v353_v54 = vsub.f32 %v303_v49, %v244_v45 }
  0x78   : > { %v323_v1 = vmin.f32 %v322_v61, 1.0 }
  0x79   : > { %v265_v59 = vmul.f32 -0.0187293, %v264_v56  ;;  %v271_v60 = vsub.f32 1.0, %v264_v56  ;;  %v354_v58 = vmul.f32 %v353_v54, %v353_v54 }
  0x7a   : > { %v324_v3 = vmul.f32 -0.0187293, %v323_v1  ;;  %v330_v4 = vsub.f32 1.0, %v323_v1 }
  0x7b   : > { %v266_v62 = vadd.f32 0.074261, %v265_v59  ;;  %570 = vrsqrt.f32 %v271_v60  ;;  %vm274_vm0 = vcmp.eq.f32.partialorder %v271_v60, inf  ;;  %v277_v16 = vand.u32 2147483648, %v271_v60 }
  0x7c   : > { %572 = vrcp.f32 %v307_v63  ;;  %v325_v8 = vadd.f32 0.074261, %v324_v3  ;;  %vm276_vm1 = vcmp.eq.f32.partialorder %v271_v60, 0.0  ;;  %vm333_vm2 = vcmp.eq.f32.partialorder %v330_v4, inf }
  0x7d   : > { %v267_v2 = vmul.f32 %v266_v62, %v264_v56  ;;  %574 = vrsqrt.f32 %v330_v4  ;;  %v336_v30 = vand.u32 2147483648, %v330_v4  ;;  %vm335_vm4 = vcmp.eq.f32.partialorder %v330_v4, 0.0 }
  0x7e   : > { %v326_v10 = vmul.f32 %v325_v8, %v323_v1 }
  0x7f   : > { %v268_v5 = vadd.f32 -0.2121144, %v267_v2 }
  0x80   : > { %v327_v14 = vadd.f32 -0.2121144, %v326_v10 }
  0x81   : > { %v269_v9 = vmul.f32 %v268_v5, %v264_v56 }
  0x82   : > { %v328_v19 = vmul.f32 %v327_v14, %v323_v1 }
  0x83   : > { %v270_v17 = vadd.f32 1.5707288, %v269_v9 }
  0x84   : > { %v329_v32 = vadd.f32 1.5707288, %v328_v19 }
  0x85   : > { %v571_v15 = vpop.eup %570 }
  0x86   : > { %v273_v18 = vmul.f32 %v571_v15, %v271_v60  ;;  %v573_v23 = vpop.eup %572 }
  0x87   : > { %v575_v27 = vpop.eup %574  ;;  %v309_v36 = vmul.f32 %v573_v23, %v306_v22 }
  0x88   : > { %v275_v21 = vsel %vm274_vm0, %v271_v60, %v273_v18  ;;  %v332_v33 = vmul.f32 %v575_v27, %v330_v4 }
  0x89   : > { %v278_v24 = vsel %vm276_vm1, %v277_v16, %v275_v21  ;;  %v310_v42 = vsub.f32 1.0, %v309_v36 }
  0x8a   : > { %v279_v29 = vmul.f32 %v278_v24, %v270_v17  ;;  %v334_v37 = vsel %vm333_vm2, %v330_v4, %v332_v33 }
  0x8b   : > { %v337_v39 = vsel %vm335_vm4, %v336_v30, %v334_v37  ;;  %vm345_vm9 = vcmp.eq.f32.partialorder %v310_v42, 0.0  ;;  %v350_v51 = vsub.f32 %v310_v42, %v251_v34 }
  0x8c   : > { %v281_v35 = vsub.f32 3.1415927, %v279_v29  ;;  %v338_v41 = vmul.f32 %v337_v39, %v329_v32 }
  0x8d   : > { %v351_v55 = vmul.f32 %v350_v51, %v350_v51 }
  0x8e   : > { %v282_v38 = vsel %vm280_vm3, %v281_v35, %v279_v29  ;;  %v340_v44 = vsub.f32 3.1415927, %v338_v41 }
  0x8f   : > { %v284_v40 = vsub.f32 6.2831855, %v282_v38 }
  0x90   : > { %v341_v47 = vsel %vm339_vm7, %v340_v44, %v338_v41 }
  0x91   : > { %v285_v43 = vsel %vm283_vm5, %v284_v40, %v282_v38  ;;  %v343_v25 = vsub.f32 6.2831855, %v341_v47 }
  0x92   : > { %v287_v46 = vsel %vm286_vm6, 0.0, %v285_v43 }
  0x93   : > { %v288_v26 = vmul.f32 0.15915494, %v287_v46  ;;  %v344_v50 = vsel %vm342_vm8, %v343_v25, %v341_v47 }
  0x94   : > { %v346_v52 = vsel %vm345_vm9, 0.0, %v344_v50 }
  0x95   : > { %v347_v53 = vmul.f32 0.15915494, %v346_v52 }
  0x97   : > { %v348_v48 = vsub.f32 %v347_v53, %v288_v26 }
  0x99   : > { %v349_v56 = vmul.f32 %v348_v48, %v348_v48 }
  0x9b   : > { %v352_v28 = vadd.f32 %v351_v55, %v349_v56 }
  0x9d   : > { %v355_v31 = vadd.f32 %v354_v58, %v352_v28 }
  0x9f   : > { %356 = vst [vmem:[%s223_s11] sm:$0x3] %v355_v31 }
  0xa0   : > { %649 = shalt.err (!%p646_p11)
}
  0xa1   : > { %s650_s29 = scalar_lea.hbm %s977_s7, 32  ;;  %s654_s5 = scalar_lea.hbm %s1027_s3, 64 }
  0xa2   : > { %p651_p1 = scmp.ne.s32.totalorder %s977_s7, %s650_s29  ;;  %p655_p4 = scmp.lt.u32.totalorder %s977_s7, %s1027_s3 }
  0xa3   : > { %p656_p6 = scmp.lt.u32.totalorder %s654_s5, %s650_s29  ;;  %p658_p0 = scmp.lt.u32.totalorder %s650_s29, %s977_s7 }
  0xa4   : > { %p652_p5 = pnand %p651_p1, %p1038_p3 }
  0xa5   : > { %p657_p8 = por %p656_p6, %p655_p4 }
  0xa6   : > { %p653_p2 = pneg %p652_p5 }
  0xa7   : > { %p659_p12 = por %p658_p0, %p657_p8 }
  0xa9   : > { %p660_p13 = pnand %p659_p12, %p653_p2 }
  0xab   : > { %663 = shalt.err (!%p660_p13)
}
  0xac   : > { %499 = dma.vmem_to_hbm [thread:$0]  (%p1038_p3), %s972_s20, 32, %s977_s7, %s358_s17  }
  0xad PF: > { %s384_s10 = sand.u32 1, %s702_s12   ;;  %p1039_p7 = scmp.ne.s32.totalorder %s1033_s26, 0 }
  0xae   : > { %p1040_p10 = scmp.ge.s32.totalorder %s722_s16, 2  ;;  %s385_s23 = scalar_lea.sflag [#allocation6], %s384_s10 }
  0xb0   : > { %p509_p9 = pnand %p1040_p10, %p1039_p7 }
  0xb2   : > { %697 = dma.done.wait (!%p509_p9), %s385_s23, 32  }
  0xb3   : > { %699 = vsyncadd (!%p509_p9), %s385_s23, 4294967264  ;;  %s23_s16 = sadd.s32 1, %s722_s16   ;;  %s1041_s12 = smov %s706_s13 }
  0xb4   : > { %p20_p11 = scmp.ge.s32.totalorder %s23_s16, 4   ;;  %s1042_s13 = smov %s710_s0 }
  0xb5   : > { %s1043_s0 = smov %s805_s25  ;;  %s1044_s14 = smov %s718_s15 }
  0xb6   : > { %s1045_s15 = smov %s1047_s19  ;;  %22 = sbr.rel (!%p20_p11) target bundleno = 8 (0x8), region = 86 }
  0xbd   :  { %390 = vsyncpa [#allocation5], 1 }
  0xbe   :  { %392 = vsyncpa [#allocation5 + $0x1], 1 }
  0xbf   :  { %393 = vsyncpa [#allocation8], 1 }
  0xc0   :  { %395 = vsyncpa [#allocation8 + $0x1], 1 }
  0xc1   :  { %396 = vsyncpa [#allocation6], 1 }
  0xc2   :  { %398 = vsyncpa [#allocation6 + $0x1], 1 }

</bundles_post_ra>
